<compile_context>
chip_gen: v7x
topology: tpu7x:2x2x1
jax: 0.10.0
libtpu: 0.0.40
codegen_flags: <defaults>
</compile_context>

<pallas_src>
import jax
import jax.numpy as jnp
from jax.experimental import pallas as pl
from jax.experimental.pallas import tpu as pltpu


def temporal_graph_conv_kernel(x_ref, a_ref, w_ref, b_ref, o_ref):
    # x_ref : (N*C, Tt*V)    f32, lane-dense; cast to bf16 in VMEM
    # a_ref : (Tt*V, Tt*V)   bf16, kron(I_Tt, A_st) (same block every tile)
    # w_ref : (N*O, N*C)     bf16, kron(I_N, conv weight)
    # b_ref : (N*O, 1)       f32, per-(n,o) bias
    # o_ref : (N*O, Tt*V)    f32 output, lane-dense
    x = x_ref[...].astype(jnp.bfloat16)
    # Graph mixing: y[(n,c), t*V + w] = sum_v x[(n,c), t*V + v] * A_st[v, w]
    y = jnp.dot(x, a_ref[...], preferred_element_type=jnp.float32)
    # 1x1 conv == block-diagonal channel matmul over the folded batch.
    # Accuracy is already bounded by the bf16 inputs of the first matmul, so
    # feed the second matmul bf16 as well (no fp32 MXU emulation passes).
    out = jnp.dot(w_ref[...], y.astype(jnp.bfloat16),
                  preferred_element_type=jnp.float32)
    o_ref[...] = (out + b_ref[...]).astype(o_ref.dtype)


def _pick_t_tile(T, V, target_lanes=512):
    """Pick a T tile: divisor of T with (t*V) lane-dense (multiple of 128),
    capped at ~target_lanes lanes, preferring >=2 tiles so v7x's two
    TensorCores both get work."""
    cands = [t for t in range(1, T + 1) if T % t == 0 and (t * V) % 128 == 0]
    if not cands:
        return T  # block == full array dim (always legal)
    good = [t for t in cands if t * V <= target_lanes and T // t >= 2]
    if good:
        return max(good)
    good = [t for t in cands if t * V <= target_lanes]
    if good:
        return max(good)
    return min(cands)


def temporal_graph_conv(x, A_st, conv_w, conv_b, *, target_lanes=512):
    """x: (N, C, T, V); A_st: (V, V); conv_w: (O, C, 1, 1); conv_b: (O,)."""
    N, C, T, V = x.shape
    O = conv_w.shape[0]
    Tt = _pick_t_tile(T, V, target_lanes)
    n_tiles = T // Tt
    TVt = Tt * V

    # Free contiguous reshape: fold batch into M; keep f32 (cast in kernel).
    x_flat = x.reshape(N * C, T * V)

    # Per-tile block-diagonal graph operator.  kron(I_T, A) is periodic, so
    # every tile uses the same (Tt*V, Tt*V) block -> constant index_map,
    # single-buffered, and the full (T*V)^2 operator is never materialised.
    a_tile = jnp.kron(jnp.eye(Tt, dtype=A_st.dtype), A_st).astype(jnp.bfloat16)

    # Block-diagonal 1x1-conv weight over the folded batch: out rows are
    # (n, o), contraction rows are (n, c).
    w_big = jnp.kron(jnp.eye(N, dtype=conv_w.dtype),
                     conv_w.reshape(O, C)).astype(jnp.bfloat16)
    b_big = jnp.tile(conv_b.astype(jnp.float32), N).reshape(N * O, 1)

    def const_spec(shape):
        # Constant operand: never changes across grid steps -> single buffer.
        return pl.BlockSpec(shape, lambda t: (0, 0),
                            pipeline_mode=pl.Buffered(1))

    out_flat = pl.pallas_call(
        temporal_graph_conv_kernel,
        out_shape=jax.ShapeDtypeStruct((N * O, T * V), jnp.float32),
        grid_spec=pltpu.PrefetchScalarGridSpec(
            num_scalar_prefetch=0,
            grid=(n_tiles,),
            in_specs=[
                pl.BlockSpec((N * C, TVt), lambda t: (0, t)),
                const_spec((TVt, TVt)),
                const_spec((N * O, N * C)),
                const_spec((N * O, 1)),
            ],
            out_specs=pl.BlockSpec((N * O, TVt), lambda t: (0, t)),
        ),
        compiler_params=pltpu.CompilerParams(
            dimension_semantics=("parallel",)),
    )(x_flat, a_tile, w_big, b_big)

    # Free reshape on a contiguous array back to PyTorch's (N, O, T, V).
    return out_flat.reshape(N, O, T, V)


def reference(x, A_st, conv_w, conv_b):
    y = jnp.einsum('nctv,vw->nctw', x, A_st)
    out = jnp.einsum('oc,nctw->notw', conv_w.reshape(conv_w.shape[0], -1), y)
    return out + conv_b[None, :, None, None]


if __name__ == "__main__":
    key = jax.random.PRNGKey(0)
    k_x, k_a, k_w, k_b = jax.random.split(key, 4)

    # Small demo shapes: T*V = 256 -> two 128-lane T tiles (exercises the
    # tiled grid and gives one tile per v7x TensorCore).
    N, C_in, C_out, T, V = 2, 4, 8, 16, 16

    x = jax.random.normal(k_x, (N, C_in, T, V), dtype=jnp.float32)
    A_st = jax.random.normal(k_a, (V, V), dtype=jnp.float32)
    # Deterministic Conv2d(in, out, kernel_size=(1,1)) parameters.
    conv_w = jax.random.normal(k_w, (C_out, C_in, 1, 1), dtype=jnp.float32) * 0.1
    conv_b = jax.random.normal(k_b, (C_out,), dtype=jnp.float32) * 0.1

    out = jax.jit(temporal_graph_conv)(x, A_st, conv_w, conv_b)
    out = jax.block_until_ready(out)

    ref = reference(x, A_st, conv_w, conv_b)
    assert out.shape == (N, C_out, T, V)
    # bf16 MXU inputs with f32 accumulation -> ~1e-2 relative error budget.
    assert jnp.allclose(out, ref, atol=5e-2, rtol=5e-2)

    print("KERNEL_OK")
</pallas_src>

<mosaic_0001>
module attributes {stable_mosaic.version = 11 : i64} {
  func.func @temporal_graph_conv_kernel(%arg0: i32, %arg1: memref<8x128xf32, #tpu.memory_space<vmem>>, %arg2: memref<128x128xbf16, #tpu.memory_space<vmem>>, %arg3: memref<16x8xbf16, #tpu.memory_space<vmem>>, %arg4: memref<16x1xf32, #tpu.memory_space<vmem>>, %arg5: memref<16x128xf32, #tpu.memory_space<vmem>>) attributes {dimension_semantics = [#tpu.dimension_semantics<parallel>], iteration_bounds = array<i64: 2>, scalar_prefetch = 0 : i64, scratch_operands = 0 : i64, tpu.core_type = #tpu.core_type<tc>, window_params = [{transform_indices = @transform_0, window_bounds = array<i64: 8, 128>}, {pipeline_mode = #tpu.pipeline_mode<synchronous>, transform_indices = @transform_1, window_bounds = array<i64: 128, 128>}, {pipeline_mode = #tpu.pipeline_mode<synchronous>, transform_indices = @transform_2, window_bounds = array<i64: 16, 8>}, {pipeline_mode = #tpu.pipeline_mode<synchronous>, transform_indices = @transform_3, window_bounds = array<i64: 16, 1>}, {transform_indices = @transform_4, window_bounds = array<i64: 16, 128>}]} {
    %c0 = arith.constant 0 : index
    %c0_0 = arith.constant 0 : index
    %0 = vector.load %arg1[%c0, %c0_0] : memref<8x128xf32, #tpu.memory_space<vmem>>, vector<8x128xf32>
    %1 = arith.truncf %0 : vector<8x128xf32> to vector<8x128xbf16>
    %c0_1 = arith.constant 0 : index
    %c0_2 = arith.constant 0 : index
    %2 = vector.load %arg2[%c0_1, %c0_2] : memref<128x128xbf16, #tpu.memory_space<vmem>>, vector<128x128xbf16>
    %cst = arith.constant dense<0.000000e+00> : vector<8x128xf32>
    %3 = tpu.matmul %1, %2, %cst {dimension_numbers = #tpu.dot_dimension_numbers<[1], [0], [0], [1], [0, 0, 1, 1], [], []>} : vector<8x128xbf16>, vector<128x128xbf16>, vector<8x128xf32> -> vector<8x128xf32>
    %c0_3 = arith.constant 0 : index
    %c0_4 = arith.constant 0 : index
    %4 = vector.load %arg3[%c0_3, %c0_4] : memref<16x8xbf16, #tpu.memory_space<vmem>>, vector<16x8xbf16>
    %5 = arith.truncf %3 : vector<8x128xf32> to vector<8x128xbf16>
    %cst_5 = arith.constant dense<0.000000e+00> : vector<16x128xf32>
    %6 = tpu.matmul %4, %5, %cst_5 {dimension_numbers = #tpu.dot_dimension_numbers<[1], [0], [0], [1], [0, 0, 1, 1], [], []>} : vector<16x8xbf16>, vector<8x128xbf16>, vector<16x128xf32> -> vector<16x128xf32>
    %c0_6 = arith.constant 0 : index
    %c0_7 = arith.constant 0 : index
    %7 = vector.load %arg4[%c0_6, %c0_7] : memref<16x1xf32, #tpu.memory_space<vmem>>, vector<16x1xf32>
    %8 = vector.broadcast %7 : vector<16x1xf32> to vector<16x128xf32>
    %9 = arith.addf %6, %8 : vector<16x128xf32>
    %c0_8 = arith.constant 0 : index
    %c0_9 = arith.constant 0 : index
    %10 = vector.load %arg5[%c0_8, %c0_9] : memref<16x128xf32, #tpu.memory_space<vmem>>, vector<16x128xf32>
    tpu.vector_store %arg5[%c0_8, %c0_9], %9 {strides = array<i32>} : memref<16x128xf32, #tpu.memory_space<vmem>>, vector<16x128xf32>,
    return
  }
  func.func @transform_0(%arg0: i32) -> (i32, i32) {
    %c0_i32 = arith.constant 0 : i32
    %c0_i32_0 = arith.constant 0 : i32
    return %c0_i32, %arg0 : i32, i32
  }
  func.func @transform_1(%arg0: i32) -> (i32, i32) {
    %c0_i32 = arith.constant 0 : i32
    %c0_i32_0 = arith.constant 0 : i32
    %c0_i32_1 = arith.constant 0 : i32
    return %c0_i32, %c0_i32_0 : i32, i32
  }
  func.func @transform_2(%arg0: i32) -> (i32, i32) {
    %c0_i32 = arith.constant 0 : i32
    %c0_i32_0 = arith.constant 0 : i32
    %c0_i32_1 = arith.constant 0 : i32
    return %c0_i32, %c0_i32_0 : i32, i32
  }
  func.func @transform_3(%arg0: i32) -> (i32, i32) {
    %c0_i32 = arith.constant 0 : i32
    %c0_i32_0 = arith.constant 0 : i32
    %c0_i32_1 = arith.constant 0 : i32
    return %c0_i32, %c0_i32_0 : i32, i32
  }
  func.func @transform_4(%arg0: i32) -> (i32, i32) {
    %c0_i32 = arith.constant 0 : i32
    %c0_i32_0 = arith.constant 0 : i32
    return %c0_i32, %arg0 : i32, i32
  }
}

</mosaic_0001>

<bundles_post_ra>
// kernel: tile.8
= control target key start
LH: loop header
LB: loop body
LE: loop exit
PB: predicated region body
PF: predicated region fallthrough
CT: control target
= control target key end

     0   :  { %s22_s0 = inlined_call_operand.vmem [shape: f32[8], index: 0, kind: input, shape index: {}]   ;;  %s23_s1 = inlined_call_operand.vmem [shape: f32[2,8], index: 1, kind: output, shape index: {}]  }
   0x1   :  { %v4_v0 = vld [vmem:[%s22_s0] ss:$0 sm:$0xff] }
   0x2   :  { %5 = vst [vmem:[%s23_s1] sm:$0x3] %v4_v0 }

// kernel: tile.0
= control target key start
LH: loop header
LB: loop body
LE: loop exit
PB: predicated region body
PF: predicated region fallthrough
CT: control target
= control target key end

     0   :  { %s66_s8 = smov 125   ;;  %vm7_vm0 = vcmask 7168   ;;  %s67_s11 = smov 126   ;;  %s117_s0 = inlined_call_operand.vmem [shape: f32[2,8], index: 0, kind: input, shape index: {}]   ;;  %s118_s1 = inlined_call_operand.vmem [shape: f32[16,1], index: 1, kind: output, shape index: {}]  }
   0x1   :  { %v4_v0 = vld [vmem:[%s117_s0] sm:$0x3]  ;;  %s65_s0 = smov 127   ;;  %s68_s12 = smov 124  }
   0x2   :  { %5 = vst [vmem:[#allocation0] sm:$0x3] %v4_v0  ;;  %s69_s13 = smov 123   ;;  %s70_s14 = smov 122  }
   0x3   :  { %s71_s15 = smov 121  }
   0x9   :  { %v9_v1 = vld [vmem:[#allocation0] sm:$0x3]  }
   0xa   :  { %v21_v2 = vld [vmem:[#allocation0] sm:$0x3]   ;;  %10 = vrot.lane.b32.xlu0 %v9_v1, %s65_s0 }
   0xb   :  { %22 = vrot.lane.b32.xlu1 %v21_v2, %s66_s8  ;;  %v15_v3 = vld [vmem:[#allocation0] sm:$0x3]  }
   0xc   :  { %v27_v4 = vld [vmem:[#allocation0] sm:$0x3]  }
   0xd   :  { %v6_v5 = vld [vmem:[#allocation0] sm:$0x3]  }
   0xe   :  { %8 = vst.msk [vmem:[%s118_s1] ss:$8 sm:$0x3] %vm7_vm0, %v6_v5   ;;  %16 = vrot.lane.b32.xlu0 %v15_v3, %s67_s11  ;;  %v33_v6 = vld [vmem:[#allocation0] sm:$0x3]  }
   0xf   :  { %28 = vrot.lane.b32.xlu1 %v27_v4, %s68_s12  ;;  %v39_v7 = vld [vmem:[#allocation0] sm:$0x3]  }
  0x10   :  { %v45_v8 = vld [vmem:[#allocation0] sm:$0x3]  }
  0x12   :  { %34 = vrot.lane.b32.xlu0 %v33_v6, %s69_s13 }
  0x13   :  { %40 = vrot.lane.b32.xlu1 %v39_v7, %s70_s14 }
  0x16   :  { %46 = vrot.lane.b32.xlu0 %v45_v8, %s71_s15 }
  0x7c   :  { %v11_v9 = vpop.permute.xlu0 %10  }
  0x7d   :  { %v23_v10 = vpop.permute.xlu1 %22   ;;  %51 = vst.msk [vmem:[%s118_s1 + $0x1] ss:$8 sm:$0x3] %vm7_vm0, %v11_v9  }
  0x7e   :  { %53 = vst.msk [vmem:[%s118_s1 + $0x3] ss:$8 sm:$0x3] %vm7_vm0, %v23_v10  }
  0x80   :  { %v17_v11 = vpop.permute.xlu0 %16  }
  0x81   :  { %v29_v12 = vpop.permute.xlu1 %28   ;;  %52 = vst.msk [vmem:[%s118_s1 + $0x2] ss:$8 sm:$0x3] %vm7_vm0, %v17_v11  }
  0x82   :  { %54 = vst.msk [vmem:[%s118_s1 + $0x4] ss:$8 sm:$0x3] %vm7_vm0, %v29_v12  }
  0x84   :  { %v35_v13 = vpop.permute.xlu0 %34  }
  0x85   :  { %v41_v14 = vpop.permute.xlu1 %40   ;;  %55 = vst.msk [vmem:[%s118_s1 + $0x5] ss:$8 sm:$0x3] %vm7_vm0, %v35_v13  }
  0x86   :  { %56 = vst.msk [vmem:[%s118_s1 + $0x6] ss:$8 sm:$0x3] %vm7_vm0, %v41_v14  }
  0x88   :  { %v47_v15 = vpop.permute.xlu0 %46  }
  0x89   :  { %57 = vst.msk [vmem:[%s118_s1 + $0x7] ss:$8 sm:$0x3] %vm7_vm0, %v47_v15  }

// kernel: temporal_graph_conv.1
= control target key start
LH: loop header
LB: loop body
LE: loop exit
PB: predicated region body
PF: predicated region fallthrough
CT: control target
= control target key end

     0   :  { %s609_s15 = smov 0   ;;  %s611_s16 = smov 0   ;;  %s693_s0 = inlined_call_operand.vmem [shape: f32[8,256], index: 0, kind: input, shape index: {}]   ;;  %s694_s1 = inlined_call_operand.vmem [shape: bf16[128,128], index: 1, kind: input, shape index: {}]   ;;  %s695_s2 = inlined_call_operand.vmem [shape: bf16[16,8], index: 2, kind: input, shape index: {}]   ;;  %s696_s3 = inlined_call_operand.vmem [shape: f32[16,1], index: 3, kind: input, shape index: {}]   ;;  %s697_s4 = inlined_call_operand.vmem [shape: f32[16,256], index: 4, kind: output, shape index: {}]  }
   0x1   :  { %s613_s17 = smov 0  }
   0x2 LB: > { %s622_s18 = sadd.s32 4294967295, %s579_s17   ;;  %s624_s19 = sadd.s32 1, %s579_s17   ;;  %s579_s17 = sphi %s613_s17, %s701_s17   ;;  %s575_s16 = sphi %s611_s16, %s700_s16   ;;  %s571_s15 = sphi %s609_s15, %s699_s15  }
   0x3   : > { %s107_s20 = ssub.s32 %s579_s17, %s624_s19  ;;  %s110_s21 = sadd.s32 1, %s575_s16 }
   0x4   : > { %p108_p0 = scmp.eq.s32.totalorder %s107_s20, 0  ;;  %p120_p1 = scmp.ne.s32.totalorder %s575_s16, %s571_s15 }
   0x5   : > { %p121_p2 = scmp.eq.s32.totalorder %s622_s18, 1  ;;  %p466_p3 = scmp.ge.s32.totalorder %s579_s17, 1 }
   0x6   : > { %s632_s22 = scalar_select %p108_p0, %s575_s16, %s110_s21  }
   0x7   : > { %p634_p4 = por %p121_p2, %p120_p1  ;;  %p161_p5 = scmp.lt.s32.totalorder %s579_s17, 3 }
   0x9   : > { %p162_p6 = pnand %p466_p3, %p161_p5 }
   0xa   : > { %v548_v0 = vld [vmem:[%s694_s1] sm:$0xff] (!%p162_p6)   ;;  %v581_v1 = vmov (!%p162_p6), 0.0   ;;  %v549_v2 = vld [vmem:[%s694_s1 + $0x8] sm:$0xff] (!%p162_p6)   ;;  %vm582_vm0 = vmmov (!%p162_p6), 0   ;;  %v550_v3 = vld [vmem:[%s694_s1 + $0x10] sm:$0xff] (!%p162_p6)   ;;  %p185_p7 = scmp.lt.s32.totalorder (!%p162_p6), %s622_s18, 1 }
   0xb   : > { %165 = sbr.rel (%p162_p6) target bundleno = 486 (0x1e6), region = 36  ;;  %494 = vmatprep.subr.bf16.mxu0 (!%p162_p6), %v581_v1  ;;  %514 = vmatprep.subr.bf16.mxu1 (!%p162_p6), %v581_v1  ;;  %v551_v4 = vld [vmem:[%s694_s1 + $0x18] sm:$0xff] (!%p162_p6)   ;;  %v552_v5 = vld [vmem:[%s694_s1 + $0x20] sm:$0xff] (!%p162_p6)   ;;  %v553_v6 = vld [vmem:[%s694_s1 + $0x28] sm:$0xff] (!%p162_p6)   ;;  %v583_v12 = vmov (!%p162_p6), 0   ;;  %vm320_vm1 = vcmask (!%p162_p6), 1043456  }
   0xc   : > { %495 = vmatpush3.bf16.msra.mxu0 (!%p162_p6), %v548_v0  ;;  %510 = vmatprep.mubr.msk.bf16.mxu0 (!%p162_p6), %vm582_vm0, %v581_v1  ;;  %v554_v7 = vld [vmem:[%s694_s1 + $0x30] sm:$0xff] (!%p162_p6)   ;;  %v555_v8 = vld [vmem:[%s694_s1 + $0x38] sm:$0xff] (!%p162_p6)   ;;  %v299_v11 = vld [vmem:[%s696_s3] sm:$0xff] (!%p162_p6)  ;;  %vm316_vm2 = vcmask (!%p162_p6), 64512   ;;  %s182_s5 = sand.u32 (!%p162_p6), 1, %s571_s15  }
   0xd   : > { %496 = vmatprep.subr.bf16.mxu0 (!%p162_p6), %v581_v1  ;;  %516 = vmatprep.mubr.msk.bf16.mxu1 (!%p162_p6), %vm582_vm0, %v581_v1  ;;  %v300_v13 = vld [vmem:[%s696_s3 + $0x8] sm:$0xff] (!%p162_p6)  ;;  %v556_v20 = vld [vmem:[%s695_s2] sm:$0xff] (!%p162_p6)   ;;  %s467_s6 = sshll.u32 (!%p162_p6), %s182_s5, 4 }
   0xe   : > { %547 = vset.pattern.permute.xlu0 (!%p162_p6), %v583_v12  ;;  %s184_s7 = scalar_lea.vmem (!%p162_p6), [#allocation2], %s467_s6 }
   0xf   : > { %303 = vperm.xlu0 (!%p162_p6), %547, %v299_v11  }
  0x10   : > { %497 = vmatpush3.bf16.msra.mxu0 (!%p162_p6), %v549_v2 }
  0x11   : > { %498 = vmatprep.subr.bf16.mxu0 (!%p162_p6), %v581_v1 }
  0x12   : > { %s186_s8 = scalar_select %p185_p7, %s622_s18, 1 }
  0x13   : > { %308 = vperm.xlu0 %547, %v300_v13  }
  0x14   : > { %499 = vmatpush3.bf16.msra.mxu0 %v550_v3  ;;  %s468_s11 = sshll.u32 %s186_s8, 3  ;;  %s480_s8 = sshll.u32 (%p634_p4), %s622_s18, 3 }
  0x15   : > { %500 = vmatprep.subr.bf16.mxu0 %v581_v1  ;;  %s188_s20 = scalar_lea.vmem %s693_s0, %s468_s11  ;;  %s375_s10 = scalar_lea.vmem (%p634_p4), %s697_s4, %s480_s8 }
  0x16   : > { %v190_v9 = vld [vmem:[%s188_s20] sm:$0xff] }
  0x17   : > { %v191_v10 = vpack.c.bf16 %v190_v9, %v190_v9 }
  0x18   : > { %501 = vmatpush3.bf16.msra.mxu0 %v551_v4 }
  0x19   : > { %502 = vmatprep.subr.bf16.mxu0 %v581_v1 }
  0x1c   : > { %503 = vmatpush3.bf16.msra.mxu0 %v552_v5 }
  0x1d   : > { %504 = vmatprep.subr.bf16.mxu0 %v581_v1 }
  0x20   : > { %505 = vmatpush3.bf16.msra.mxu0 %v553_v6 }
  0x21   : > { %506 = vmatprep.subr.bf16.mxu0 %v581_v1 }
  0x24   : > { %507 = vmatpush3.bf16.msra.mxu0 %v554_v7 }
  0x25   : > { %508 = vmatprep.subr.bf16.mxu0 %v581_v1 }
  0x28   : > { %509 = vmatpush3.bf16.msra.mxu0 %v555_v8 }
  0x2b   : > { %511 = vmatmul.mubr.bf16.vlgmr.msra.gmra.mrb[0].mxu0 %v191_v10 }
  0x8e   : > { %v304_v21 = vpop.permute.xlu0 %303 }
  0x92   : > { %v309_v25 = vpop.permute.xlu0 %308 }
  0xfe   : > { %v290_v14 = vpop.f32.mrb[0].mxu0 }
  0xff   : > { %v298_v15 = vpack.c.bf16 %v290_v14, %v290_v14  ;;  %v512_v16 = vpop.f32.mrb[1].mxu0 }
 0x100   : > { %v293_v17 = vpop.f32.mrb[2].mxu0 }
 0x101   : > { %v513_v18 = vpop.f32.mrb[3].mxu0  ;;  %v322_v19 = vsel %vm320_vm1, %v298_v15, 0 }
 0x102   : > { %515 = vmatpush3.bf16.msra.mxu1 %v322_v19 }
 0x105   : > { %517 = vmatmul.mubr.msk.bf16.vlgmr.msra.gmra.mrb[0].mxu1 %vm316_vm2, %v556_v20 }
 0x1d7   : > { %373 = sbr.rel (!%p634_p4) target bundleno = 486 (0x1e6), region = 40 }
 0x1d8   : > { %v358_v22 = vpop.f32.mrb[0].mxu1 }
 0x1d9   : > { %v359_v23 = vadd.f32 %v358_v22, %v304_v21  ;;  %v518_v24 = vpop.f32.mrb[1].mxu1 }
 0x1da   : > { %v361_v26 = vpop.f32.mrb[2].mxu1 }
 0x1db   : > { %365 = vst [vmem:[%s184_s7] sm:$0xff] %v359_v23  ;;  %v362_v27 = vadd.f32 %v361_v26, %v309_v25  ;;  %v519_v28 = vpop.f32.mrb[3].mxu1 }
 0x1dd   : > { %366 = vst [vmem:[%s184_s7 + $0x8] sm:$0xff] %v362_v27 }
 0x1e2   : > { %v405_v29 = vld [vmem:[%s184_s7] sm:$0xff] }
 0x1e3   : > { %406 = vst [vmem:[%s375_s10] sm:$0xff] %v405_v29 }
 0x1e4   : > { %v407_v30 = vld [vmem:[%s184_s7 + $0x8] sm:$0xff] }
 0x1e5   : > { %408 = vst [vmem:[%s375_s10 + $0x10] sm:$0xff] %v407_v30 }
 0x1e6 PF: > { %p11_p8 = scmp.ge.s32.totalorder %s624_s19, 4   ;;  %s699_s15 = smov %s575_s16 }
 0x1e7   : > { %s700_s16 = smov %s632_s22  ;;  %s701_s17 = smov %s624_s19 }
 0x1e8   :  { %13 = sbr.rel (!%p11_p8) target bundleno = 2 (0x2), region = 104 }

</bundles_post_ra>
